<compile_context>
chip_gen: v7x
topology: tpu7x:2x2x1
jax: 0.10.0
libtpu: 0.0.40
codegen_flags: <defaults>
</compile_context>

<pallas_src>
import jax
import jax.numpy as jnp
from jax import lax
from jax.experimental import pallas as pl
from jax.experimental.pallas import tpu as pltpu


_CHUNK_ROWS = 16                  # sublane rows per inner-loop chunk
_CHUNK_PX = _CHUNK_ROWS * 128     # 2048 pixels per chunk (one bf16 vreg tile / class)


def _cdiv(a, b):
    return -(-a // b)


def _make_dice_kernel(num_classes, chunks_per_tile, needs_mask, unroll):
    """Builds the per-(batch, pixel-partition) partial-sum kernel."""

    def kernel(logits_ref, targets_ref, inter_ref, card_ref):
        # logits_ref : (1, C, chunks_per_tile, 16, 128)  bf16/f32
        # targets_ref: (1, 1, chunks_per_tile, 16, 128)  int8/int32 (pad = -1)
        # inter_ref / card_ref : (1, C, 16, 128) f32, VMEM-resident across the
        # innermost ("arbitrary") grid axis — they are the accumulators.
        i = pl.program_id(2)

        @pl.when(i == 0)
        def _init():
            inter_ref[...] = jnp.zeros(inter_ref.shape, inter_ref.dtype)
            card_ref[...] = jnp.zeros(card_ref.shape, card_ref.dtype)

        def chunk_step(j, carry):
            inter, card = carry
            x = logits_ref[0, :, j, :, :].astype(jnp.float32)       # (C, 16, 128)
            t = targets_ref[0, 0, j, :, :].astype(jnp.int32)        # (16, 128)

            # one-hot along the class axis (a leading/register axis, so the
            # compare and the class reductions below are pure VPU work).
            cls = lax.broadcasted_iota(jnp.int32, x.shape, 0)
            onehot = (cls == t[None, :, :]).astype(jnp.float32)

            # numerically stable softmax over classes
            m = jnp.max(x, axis=0, keepdims=True)
            ex = jnp.exp(x - m)                                      # EUP
            se = jnp.sum(ex, axis=0, keepdims=True)
            probs = ex * pl.reciprocal(se, approx=True)              # EUP vrcp

            inter = inter + probs * onehot
            if needs_mask:
                # padded pixels have target == -1: onehot is already 0 there,
                # probs must be masked out of the cardinality sum.
                valid = (t[None, :, :] >= 0).astype(jnp.float32)
                card = card + probs * valid + onehot
            else:
                card = card + probs + onehot
            return inter, card

        zero = jnp.zeros((num_classes, _CHUNK_ROWS, 128), jnp.float32)
        inter, card = lax.fori_loop(0, chunks_per_tile, chunk_step, (zero, zero),
                                    unroll=unroll)
        # single small RMW of the VMEM-resident output block per grid step
        inter_ref[0] += inter
        card_ref[0] += card

    return kernel


def dice_loss(logits_nchw, targets_nhw, smooth=1e-6, *, parts=None,
              logits_dtype=jnp.bfloat16,
              vmem_input_budget_bytes=16 * 1024 * 1024):
    """Soft multiclass Dice loss matching PyTorch DiceLoss.forward semantics."""
    B, C, H, W = logits_nchw.shape
    HW = H * W

    # v7x has 2 TensorCores: guarantee a >=2-extent parallel grid axis.
    if parts is None:
        parts = 2 if B == 1 else 1

    # Narrow target stream: int8 when the class id fits, else int32 fallback.
    tgt_dtype = jnp.int8 if C <= 127 else jnp.int32
    tgt_bytes = jnp.dtype(tgt_dtype).itemsize
    logit_bytes = jnp.dtype(logits_dtype).itemsize

    # ---- budget-driven tile sizing ----------------------------------------
    # Each grid step streams chunks_per_tile chunks of 2048 pixels.  Size the
    # tile so the double-buffered input blocks stay under the budget; the
    # resulting multi-MiB per-step DMA makes the ~0.35us grid-step overhead
    # negligible while staying safely inside the 48 MiB scoped-VMEM cap.
    bytes_per_chunk_in = _CHUNK_PX * (C * logit_bytes + tgt_bytes)
    max_chunks_per_tile = max(1, vmem_input_budget_bytes // (2 * bytes_per_chunk_in))

    chunks_per_part_raw = _cdiv(HW, parts * _CHUNK_PX)
    chunks_per_tile = min(max_chunks_per_tile, chunks_per_part_raw)
    n_tiles = _cdiv(chunks_per_part_raw, chunks_per_tile)
    chunks_per_tile = _cdiv(chunks_per_part_raw, n_tiles)   # rebalance: less padding
    chunks_per_part = n_tiles * chunks_per_tile
    padded_hw = parts * chunks_per_part * _CHUNK_PX
    needs_mask = padded_hw != HW

    if chunks_per_tile % 4 == 0:
        unroll = 4
    elif chunks_per_tile % 2 == 0:
        unroll = 2
    else:
        unroll = 1

    # ---- host-side layout: reshapes + pad only, NO transpose of the logits ---
    logits = logits_nchw.reshape(B, C, HW).astype(logits_dtype)
    targets = targets_nhw.reshape(B, 1, HW).astype(tgt_dtype)
    if needs_mask:
        pad = padded_hw - HW
        logits = jnp.pad(logits, ((0, 0), (0, 0), (0, pad)))
        targets = jnp.pad(targets, ((0, 0), (0, 0), (0, pad)), constant_values=-1)
    n_chunks_total = padded_hw // _CHUNK_PX
    logits = logits.reshape(B, C, n_chunks_total, _CHUNK_ROWS, 128)
    targets = targets.reshape(B, 1, n_chunks_total, _CHUNK_ROWS, 128)

    grid = (B, parts, n_tiles)
    out_shapes = (
        jax.ShapeDtypeStruct((B * parts, C, _CHUNK_ROWS, 128), jnp.float32),
        jax.ShapeDtypeStruct((B * parts, C, _CHUNK_ROWS, 128), jnp.float32),
    )

    kernel = _make_dice_kernel(C, chunks_per_tile, needs_mask, unroll)

    inter, card = pl.pallas_call(
        kernel,
        out_shape=out_shapes,
        grid_spec=pltpu.PrefetchScalarGridSpec(
            num_scalar_prefetch=0,
            grid=grid,
            in_specs=[
                # TODO(synk): sweep pipeline_mode=pl.Buffered(3) here if profiling
                # shows the per-step DMA is still exposed after budget-sized tiles.
                pl.BlockSpec((1, C, chunks_per_tile, _CHUNK_ROWS, 128),
                             lambda b, p, i: (b, 0, p * n_tiles + i, 0, 0)),
                pl.BlockSpec((1, 1, chunks_per_tile, _CHUNK_ROWS, 128),
                             lambda b, p, i: (b, 0, p * n_tiles + i, 0, 0)),
            ],
            out_specs=[
                pl.BlockSpec((1, C, _CHUNK_ROWS, 128),
                             lambda b, p, i: (b * parts + p, 0, 0, 0)),
                pl.BlockSpec((1, C, _CHUNK_ROWS, 128),
                             lambda b, p, i: (b * parts + p, 0, 0, 0)),
            ],
        ),
        compiler_params=pltpu.CompilerParams(
            dimension_semantics=("parallel", "parallel", "arbitrary"),
            # above the v5e (16 MiB) / v6e (32 MiB) scoped defaults,
            # comfortably under v7x's 64 MiB physical VMEM.
            vmem_limit_bytes=48 * 1024 * 1024,
        ),
    )(logits, targets)

    # tiny O(B*parts*C*2048) glue in plain JAX
    inter_c = jnp.sum(inter, axis=(0, 2, 3))      # (C,)
    card_c = jnp.sum(card, axis=(0, 2, 3))        # (C,)
    dice_score = (2.0 * inter_c + smooth) / (card_c + smooth)
    return 1.0 - jnp.mean(dice_score)


def _reference_dice_loss(logits_nchw, targets_nhw, smooth=1e-6):
    """Pure-JAX reference reproducing the PyTorch DiceLoss semantics."""
    C = logits_nchw.shape[1]
    probs = jax.nn.softmax(logits_nchw.astype(jnp.float32), axis=1)
    onehot = jax.nn.one_hot(targets_nhw, C, axis=1, dtype=jnp.float32)
    inter = jnp.sum(probs * onehot, axis=(0, 2, 3))
    card = jnp.sum(probs + onehot, axis=(0, 2, 3))
    dice = (2.0 * inter + smooth) / (card + smooth)
    return 1.0 - jnp.mean(dice)


if __name__ == "__main__":
    key = jax.random.PRNGKey(0)
    k1, k2, k3, k4 = jax.random.split(key, 4)

    # Case 1: B=2, C=4, 16x16 — exercises the padded/masked last-tile path
    # (256 px per image padded up to one 2048-px chunk).
    B, C, H, W = 2, 4, 16, 16
    logits = jax.random.normal(k1, (B, C, H, W), dtype=jnp.float32)
    targets = jax.random.randint(k2, (B, H, W), 0, C, dtype=jnp.int32)

    loss_f32 = jax.block_until_ready(
        dice_loss(logits, targets, logits_dtype=jnp.float32))
    ref = _reference_dice_loss(logits, targets)
    assert jnp.allclose(loss_f32, ref, rtol=5e-3, atol=5e-3), (loss_f32, ref)

    # Default path: bf16-streamed logits (f32 math inside the kernel).
    loss_bf16 = jax.block_until_ready(dice_loss(logits, targets))
    ref_bf16 = _reference_dice_loss(logits.astype(jnp.bfloat16), targets)
    assert jnp.allclose(loss_bf16, ref_bf16, rtol=5e-3, atol=5e-3), (loss_bf16, ref_bf16)

    # Case 2: B=1 (auto parts=2 -> dual-TensorCore path on v7x), odd C and
    # non-128-multiple spatial dims.
    B2, C2, H2, W2 = 1, 3, 17, 13
    logits2 = jax.random.normal(k3, (B2, C2, H2, W2), dtype=jnp.float32)
    targets2 = jax.random.randint(k4, (B2, H2, W2), 0, C2, dtype=jnp.int32)
    loss2 = jax.block_until_ready(
        dice_loss(logits2, targets2, logits_dtype=jnp.float32))
    ref2 = _reference_dice_loss(logits2, targets2)
    assert jnp.allclose(loss2, ref2, rtol=5e-3, atol=5e-3), (loss2, ref2)

    print("KERNEL_OK")
</pallas_src>

<mosaic_0001>
module attributes {stable_mosaic.version = 11 : i64} {
  func.func @kernel(%arg0: i32, %arg1: i32, %arg2: i32, %arg3: memref<1x4x1x16x128xf32, #tpu.memory_space<vmem>>, %arg4: memref<1x1x1x16x128xi8, #tpu.memory_space<vmem>>, %arg5: memref<1x4x16x128xf32, #tpu.memory_space<vmem>>, %arg6: memref<1x4x16x128xf32, #tpu.memory_space<vmem>>) attributes {dimension_semantics = [#tpu.dimension_semantics<parallel>, #tpu.dimension_semantics<parallel>, #tpu.dimension_semantics<arbitrary>], iteration_bounds = array<i64: 2, 1, 1>, scalar_prefetch = 0 : i64, scratch_operands = 0 : i64, tpu.core_type = #tpu.core_type<tc>, window_params = [{transform_indices = @transform_0, window_bounds = array<i64: 1, 4, 1, 16, 128>}, {transform_indices = @transform_1, window_bounds = array<i64: 1, 1, 1, 16, 128>}, {transform_indices = @transform_2, window_bounds = array<i64: 1, 4, 16, 128>}, {transform_indices = @transform_3, window_bounds = array<i64: 1, 4, 16, 128>}]} {
    %c0_i32 = arith.constant 0 : i32
    %0 = arith.cmpi eq, %arg2, %c0_i32 : i32
    %1 = arith.extui %0 : i1 to i32
    %c0_i32_0 = arith.constant 0 : i32
    %2 = arith.cmpi ne, %1, %c0_i32_0 : i32
    scf.if %2 {
      %cst_28 = arith.constant 0.000000e+00 : f32
      %50 = vector.broadcast %cst_28 : f32 to vector<1x4x16x128xf32>
      %c0_29 = arith.constant 0 : index
      %c0_30 = arith.constant 0 : index
      %c0_31 = arith.constant 0 : index
      %c0_32 = arith.constant 0 : index
      %51 = vector.load %arg5[%c0_29, %c0_30, %c0_31, %c0_32] : memref<1x4x16x128xf32, #tpu.memory_space<vmem>>, vector<1x4x16x128xf32>
      tpu.vector_store %arg5[%c0_29, %c0_30, %c0_31, %c0_32], %50 {strides = array<i32>} : memref<1x4x16x128xf32, #tpu.memory_space<vmem>>, vector<1x4x16x128xf32>,
      %cst_33 = arith.constant 0.000000e+00 : f32
      %52 = vector.broadcast %cst_33 : f32 to vector<1x4x16x128xf32>
      %c0_34 = arith.constant 0 : index
      %c0_35 = arith.constant 0 : index
      %c0_36 = arith.constant 0 : index
      %c0_37 = arith.constant 0 : index
      %53 = vector.load %arg6[%c0_34, %c0_35, %c0_36, %c0_37] : memref<1x4x16x128xf32, #tpu.memory_space<vmem>>, vector<1x4x16x128xf32>
      tpu.vector_store %arg6[%c0_34, %c0_35, %c0_36, %c0_37], %52 {strides = array<i32>} : memref<1x4x16x128xf32, #tpu.memory_space<vmem>>, vector<1x4x16x128xf32>,
    } else {
    }
    %cst = arith.constant 0.000000e+00 : f32
    %3 = vector.broadcast %cst : f32 to vector<4x16x128xf32>
    %c0_i32_1 = arith.constant 0 : i32
    %c0 = arith.constant 0 : index
    %c0_2 = arith.constant 0 : index
    %4 = arith.index_cast %c0_i32_1 : i32 to index
    %c0_3 = arith.constant 0 : index
    %c0_4 = arith.constant 0 : index
    %5 = vector.load %arg3[%c0, %c0_2, %4, %c0_3, %c0_4] : memref<1x4x1x16x128xf32, #tpu.memory_space<vmem>>, vector<1x4x1x16x128xf32>
    %6 = vector.shape_cast %5 : vector<1x4x1x16x128xf32> to vector<4x16x128xf32>
    %c0_5 = arith.constant 0 : index
    %c0_6 = arith.constant 0 : index
    %7 = arith.index_cast %c0_i32_1 : i32 to index
    %c0_7 = arith.constant 0 : index
    %c0_8 = arith.constant 0 : index
    %8 = vector.load %arg4[%c0_5, %c0_6, %7, %c0_7, %c0_8] : memref<1x1x1x16x128xi8, #tpu.memory_space<vmem>>, vector<1x1x1x16x128xi8>
    %9 = vector.shape_cast %8 : vector<1x1x1x16x128xi8> to vector<16x128xi8>
    %10 = arith.extsi %9 : vector<16x128xi8> to vector<16x128xi32>
    %11 = tpu.iota {dimensions = array<i32: 0>} : vector<4x16x128xi32>
    %12 = vector.shape_cast %10 : vector<16x128xi32> to vector<1x16x128xi32>
    %13 = vector.broadcast %12 : vector<1x16x128xi32> to vector<4x16x128xi32>
    %14 = arith.cmpi eq, %11, %13 : vector<4x16x128xi32>
    %15 = arith.extui %14 : vector<4x16x128xi1> to vector<4x16x128xi32>
    %16 = arith.sitofp %15 : vector<4x16x128xi32> to vector<4x16x128xf32>
    %cst_9 = arith.constant dense<0xFF800000> : vector<16x128xf32>
    %17 = vector.multi_reduction <maximumf>, %6, %cst_9 [0] : vector<4x16x128xf32> to vector<16x128xf32>
    %18 = vector.shape_cast %17 : vector<16x128xf32> to vector<1x16x128xf32>
    %19 = vector.broadcast %18 : vector<1x16x128xf32> to vector<4x16x128xf32>
    %20 = arith.subf %6, %19 : vector<4x16x128xf32>
    %21 = math.exp %20 : vector<4x16x128xf32>
    %cst_10 = arith.constant dense<0.000000e+00> : vector<16x128xf32>
    %22 = vector.multi_reduction <add>, %21, %cst_10 [0] : vector<4x16x128xf32> to vector<16x128xf32>
    %23 = vector.shape_cast %22 : vector<16x128xf32> to vector<1x16x128xf32>
    %24 = tpu.reciprocal %23 {approx = true} : vector<1x16x128xf32> -> vector<1x16x128xf32>
    %25 = vector.broadcast %24 : vector<1x16x128xf32> to vector<4x16x128xf32>
    %26 = arith.mulf %21, %25 : vector<4x16x128xf32>
    %27 = arith.mulf %26, %16 : vector<4x16x128xf32>
    %28 = arith.addf %3, %27 : vector<4x16x128xf32>
    %29 = vector.shape_cast %10 : vector<16x128xi32> to vector<1x16x128xi32>
    %c0_i32_11 = arith.constant 0 : i32
    %30 = vector.broadcast %c0_i32_11 : i32 to vector<1x16x128xi32>
    %31 = arith.cmpi sge, %29, %30 : vector<1x16x128xi32>
    %32 = arith.extui %31 : vector<1x16x128xi1> to vector<1x16x128xi32>
    %33 = arith.sitofp %32 : vector<1x16x128xi32> to vector<1x16x128xf32>
    %34 = vector.broadcast %33 : vector<1x16x128xf32> to vector<4x16x128xf32>
    %35 = arith.mulf %26, %34 : vector<4x16x128xf32>
    %36 = arith.addf %3, %35 : vector<4x16x128xf32>
    %37 = arith.addf %36, %16 : vector<4x16x128xf32>
    %c1_i32 = arith.constant 1 : i32
    %c0_12 = arith.constant 0 : index
    %c0_13 = arith.constant 0 : index
    %c0_14 = arith.constant 0 : index
    %c0_15 = arith.constant 0 : index
    %38 = vector.load %arg5[%c0_12, %c0_13, %c0_14, %c0_15] : memref<1x4x16x128xf32, #tpu.memory_space<vmem>>, vector<1x4x16x128xf32>
    %39 = vector.shape_cast %38 : vector<1x4x16x128xf32> to vector<4x16x128xf32>
    %40 = arith.addf %39, %28 : vector<4x16x128xf32>
    %c0_16 = arith.constant 0 : index
    %c0_17 = arith.constant 0 : index
    %c0_18 = arith.constant 0 : index
    %c0_19 = arith.constant 0 : index
    %41 = vector.load %arg5[%c0_16, %c0_17, %c0_18, %c0_19] : memref<1x4x16x128xf32, #tpu.memory_space<vmem>>, vector<1x4x16x128xf32>
    %42 = vector.shape_cast %41 : vector<1x4x16x128xf32> to vector<4x16x128xf32>
    %43 = vector.shape_cast %40 : vector<4x16x128xf32> to vector<1x4x16x128xf32>
    tpu.vector_store %arg5[%c0_16, %c0_17, %c0_18, %c0_19], %43 {strides = array<i32>} : memref<1x4x16x128xf32, #tpu.memory_space<vmem>>, vector<1x4x16x128xf32>,
    %c0_20 = arith.constant 0 : index
    %c0_21 = arith.constant 0 : index
    %c0_22 = arith.constant 0 : index
    %c0_23 = arith.constant 0 : index
    %44 = vector.load %arg6[%c0_20, %c0_21, %c0_22, %c0_23] : memref<1x4x16x128xf32, #tpu.memory_space<vmem>>, vector<1x4x16x128xf32>
    %45 = vector.shape_cast %44 : vector<1x4x16x128xf32> to vector<4x16x128xf32>
    %46 = arith.addf %45, %37 : vector<4x16x128xf32>
    %c0_24 = arith.constant 0 : index
    %c0_25 = arith.constant 0 : index
    %c0_26 = arith.constant 0 : index
    %c0_27 = arith.constant 0 : index
    %47 = vector.load %arg6[%c0_24, %c0_25, %c0_26, %c0_27] : memref<1x4x16x128xf32, #tpu.memory_space<vmem>>, vector<1x4x16x128xf32>
    %48 = vector.shape_cast %47 : vector<1x4x16x128xf32> to vector<4x16x128xf32>
    %49 = vector.shape_cast %46 : vector<4x16x128xf32> to vector<1x4x16x128xf32>
    tpu.vector_store %arg6[%c0_24, %c0_25, %c0_26, %c0_27], %49 {strides = array<i32>} : memref<1x4x16x128xf32, #tpu.memory_space<vmem>>, vector<1x4x16x128xf32>,
    return
  }
  func.func @transform_0(%arg0: i32, %arg1: i32, %arg2: i32) -> (i32, i32, i32, i32, i32) {
    %c1_i32 = arith.constant 1 : i32
    %0 = arith.muli %arg1, %c1_i32 : i32
    %1 = arith.addi %0, %arg2 : i32
    %c0_i32 = arith.constant 0 : i32
    %c0_i32_0 = arith.constant 0 : i32
    %c0_i32_1 = arith.constant 0 : i32
    %c0_i32_2 = arith.constant 0 : i32
    return %arg0, %c0_i32, %1, %c0_i32_0, %c0_i32_1 : i32, i32, i32, i32, i32
  }
  func.func @transform_1(%arg0: i32, %arg1: i32, %arg2: i32) -> (i32, i32, i32, i32, i32) {
    %c1_i32 = arith.constant 1 : i32
    %0 = arith.muli %arg1, %c1_i32 : i32
    %1 = arith.addi %0, %arg2 : i32
    %c0_i32 = arith.constant 0 : i32
    %c0_i32_0 = arith.constant 0 : i32
    %c0_i32_1 = arith.constant 0 : i32
    %c0_i32_2 = arith.constant 0 : i32
    return %arg0, %c0_i32, %1, %c0_i32_0, %c0_i32_1 : i32, i32, i32, i32, i32
  }
  func.func @transform_2(%arg0: i32, %arg1: i32, %arg2: i32) -> (i32, i32, i32, i32) {
    %c1_i32 = arith.constant 1 : i32
    %0 = arith.muli %arg0, %c1_i32 : i32
    %1 = arith.addi %0, %arg1 : i32
    %c0_i32 = arith.constant 0 : i32
    %c0_i32_0 = arith.constant 0 : i32
    %c0_i32_1 = arith.constant 0 : i32
    %c0_i32_2 = arith.constant 0 : i32
    return %1, %c0_i32, %c0_i32_0, %c0_i32_1 : i32, i32, i32, i32
  }
  func.func @transform_3(%arg0: i32, %arg1: i32, %arg2: i32) -> (i32, i32, i32, i32) {
    %c1_i32 = arith.constant 1 : i32
    %0 = arith.muli %arg0, %c1_i32 : i32
    %1 = arith.addi %0, %arg1 : i32
    %c0_i32 = arith.constant 0 : i32
    %c0_i32_0 = arith.constant 0 : i32
    %c0_i32_1 = arith.constant 0 : i32
    %c0_i32_2 = arith.constant 0 : i32
    return %1, %c0_i32, %c0_i32_0, %c0_i32_1 : i32, i32, i32, i32
  }
}

</mosaic_0001>

<bundles_post_ra>
// kernel: tpu_custom_call.1
= control target key start
LH: loop header
LB: loop body
LE: loop exit
PB: predicated region body
PF: predicated region fallthrough
CT: control target
= control target key end

     0   :  { %9 = vsyncpa [#allocation3], 0  ;;  %s1305_s0 = inlined_call_operand.hbm [shape: f32[2,4,1,16,128], index: 0, kind: input, shape index: {}]   ;;  %s1306_s1 = inlined_call_operand.hbm [shape: s8[2,1,1,16,128], index: 1, kind: input, shape index: {}]   ;;  %s1307_s2 = inlined_call_operand.hbm [shape: f32[2,4,16,128], index: 2, kind: output, shape index: {0}]   ;;  %s1308_s3 = inlined_call_operand.hbm [shape: f32[2,4,16,128], index: 3, kind: output, shape index: {1}]  }
   0x1   :  { %11 = vsyncpa [#allocation3 + $0x1], 0 }
   0x2   :  { %12 = vsyncpa [#allocation6], 0 }
   0x3   :  { %14 = vsyncpa [#allocation6 + $0x1], 0 }
   0x4   :  { %15 = vsyncpa [#allocation4], 0 }
   0x5   :  { %17 = vsyncpa [#allocation4 + $0x1], 0 }
   0x6   :  { %18 = vsyncpa [#allocation9], 0 }
   0x7   :  { %20 = vsyncpa [#allocation9 + $0x1], 0  ;;  %s1014_s12 = smov 0   ;;  %s1016_s13 = smov 0  }
   0x8   :  { %s1018_s14 = smov 0   ;;  %s1020_s15 = smov 0  }
   0x9   :  { %s1022_s16 = smov 0   ;;  %s1024_s17 = smov 0  }
   0xa LB: > { %s663_s18 = sadd.s32 4294967295, %s981_s17   ;;  %s664_s19 = sadd.s32 4294967294, %s981_s17   ;;  %s981_s17 = sphi %s1024_s17, %s26_s17   ;;  %s977_s16 = sphi %s1022_s16, %s1326_s16   ;;  %s973_s15 = sphi %s1020_s15, %s1325_s15   ;;  %s969_s14 = sphi %s1018_s14, %s1324_s14   ;;  %s965_s13 = sphi %s1016_s13, %s1323_s13   ;;  %s961_s12 = sphi %s1014_s12, %s1322_s12  }
   0xb   : > { %s45_s20 = sadd.s32 1, %s977_s16  ;;  %s56_s21 = sadd.s32 1, %s969_s14 }
   0xc   : > { %p47_p0 = scmp.ge.s32.totalorder %s45_s20, 2  ;;  %p63_p1 = scmp.ne.s32.totalorder %s969_s14, %s965_s13 }
   0xd   : > { %p64_p2 = scmp.eq.s32.totalorder %s981_s17, 0  ;;  %p69_p3 = scmp.ne.s32.totalorder %s965_s13, %s961_s12 }
   0xe   : > { %s1328_s20 = smov (%p47_p0, %s45_s20), 0  ;;  %p70_p5 = scmp.eq.s32.totalorder %s663_s18, 0 }
   0xf   : > { %p1055_p4 = por %p64_p2, %p63_p1  ;;  %s51_s23 = ssub.s32 %s977_s16, %s1328_s20 }
  0x10   : > { %p125_p6 = scmp.eq.s32.totalorder %s663_s18, 1  ;;  %p54_p7 = scmp.eq.s32.totalorder %s51_s23, 0 }
  0x11   : > { %p1061_p8 = por %p70_p5, %p69_p3  ;;  %p131_p10 = scmp.eq.s32.totalorder %s664_s19, 1 }
  0x12   : > { %p1065_p9 = por %p125_p6, %p63_p1  ;;  %p726_p13 = scmp.lt.s32.totalorder %s981_s17, 2 }
  0x13   : > { %s1312_s24 = scalar_select %p1061_p8, 1, 0 }
  0x14   : > { %s1313_s25 = scalar_select %p1065_p9, 1, 0 }
  0x15   : > { %s1070_s26 = scalar_select %p54_p7, %s969_s14, %s56_s21  }
  0x16   : > { %p1072_p11 = por %p131_p10, %p69_p3  ;;  %s1079_s28 = sand.u32 1, %s969_s14  }
  0x17   : > { %s667_s29 = sshll.u32 %s1079_s28, 6  ;;  %s696_s30 = sshll.u32 %s977_s16, 10 }
  0x18   : > { %s1314_s27 = scalar_select %p1072_p11, 1, 0 }
  0x19   : > { %s1086_s6 = scalar_lea.hbm %s1305_s0, %s696_s30  ;;  %s183_s7 = scalar_lea.vmem [#allocation2], %s667_s29 }
  0x1a   : > { %s193_s8 = sshll.u32 %s183_s7, 4  ;;  %p1092_p0 = pnand %p726_p13, %p1055_p4  ;;  %s1088_s8 = int_to_ptr.vmem [resolvable:$true] %s193_s8 }
  0x1b   : > { %s180_s10 = scalar_lea.sflag [#allocation3], %s1079_s28  ;;  %s803_s11 = scalar_lea.hbm %s1086_s6, 1024 }
  0x1c   : > { %p804_p2 = scmp.ne.s32.totalorder %s1086_s6, %s803_s11  ;;  %p805_p3 = pneg %p1092_p0 }
  0x1d   : > { %s808_s21 = scalar_lea.hbm %s1305_s0, 2048  ;;  %p809_p4 = scmp.lt.u32.totalorder %s1086_s6, %s1305_s0 }
  0x1e   : > { %p806_p5 = pnand %p805_p3, %p804_p2  ;;  %p810_p7 = scmp.lt.u32.totalorder %s808_s21, %s803_s11 }
  0x1f   : > { %p812_p13 = scmp.lt.u32.totalorder %s803_s11, %s1086_s6 }
  0x20   : > { %p807_p6 = pneg %p806_p5  ;;  %p811_p10 = por %p810_p7, %p809_p4 }
  0x22   : > { %p813_p12 = por %p812_p13, %p811_p10 }
  0x24   : > { %p814_p1 = pnand %p813_p12, %p807_p6 }
  0x26   : > { %817 = shalt.err (!%p814_p1)
}
  0x27   : > { %s818_s29 = scalar_lea.vmem %s1088_s8, 1024  ;;  %s983_s30 = smov [#allocation2]  }
  0x28   : > { %p819_p2 = scmp.ne.s32.totalorder %s1088_s8, %s818_s29  ;;  %s823_s4 = sshll.u32 %s983_s30, 4  ;;  %s824_s4 = int_to_ptr.vmem [resolvable:$false] %s823_s4 }
  0x29   : > { %s825_s5 = scalar_lea.vmem %s824_s4, 2048  ;;  %p826_p9 = scmp.lt.s32.totalorder %s1088_s8, %s824_s4 }
  0x2a   : > { %p821_p5 = pnand %p819_p2, %p805_p3  ;;  %p827_p4 = scmp.lt.s32.totalorder %s825_s5, %s818_s29 }
  0x2c   : > { %p822_p11 = pneg %p821_p5  ;;  %p828_p7 = por %p827_p4, %p826_p9 }
  0x2e   : > { %p829_p10 = pnand %p828_p7, %p822_p11 }
  0x30   : > { %832 = shalt.err (!%p829_p10)
}
  0x31   : > { %s984_s7 = smov 128   ;;  %s985_s11 = smov 8  }
  0x32   : > { %715 = dma.hbm_to_vmem [thread:$0]  (!%p1092_p0), %s1086_s6, 1024, %s1088_s8, %s180_s10, %s984_s7, %s984_s7, %s985_s11  }
  0x33   : > { %p225_p12 = scmp.lt.s32.totalorder %s981_s17, 3  ;;  %s670_s18 = sshll.u32 %s1079_s28, 2 }
  0x34   : > { %s697_s19 = sshll.u32 %s977_s16, 6  ;;  %p1316_p9 = scmp.ge.s32.totalorder %s981_s17, 1 }
  0x35   : > { %s1137_s29 = scalar_lea.hbm %s1306_s1, %s697_s19  ;;  %s207_s30 = scalar_lea.vmem [#allocation5], %s670_s18 }
  0x36   : > { %p1130_p11 = pnand %p1316_p9, %p225_p12  ;;  %s217_s4 = sshll.u32 %s207_s30, 4  ;;  %s1139_s4 = int_to_ptr.vmem [resolvable:$true] %s217_s4 }
  0x37   : > { %s204_s6 = scalar_lea.sflag [#allocation6], %s1079_s28  ;;  %s833_s8 = scalar_lea.hbm %s1137_s29, 64 }
  0x38   : > { %p834_p1 = scmp.ne.s32.totalorder %s1137_s29, %s833_s8  ;;  %s838_s7 = scalar_lea.hbm %s1306_s1, 128 }
  0x39   : > { %p839_p2 = scmp.lt.u32.totalorder %s1137_s29, %s1306_s1  ;;  %p840_p5 = scmp.lt.u32.totalorder %s838_s7, %s833_s8 }
  0x3a   : > { %p836_p6 = pnand %p834_p1, %p805_p3  ;;  %p842_p7 = scmp.lt.u32.totalorder %s833_s8, %s1137_s29 }
  0x3b   : > { %p841_p4 = por %p840_p5, %p839_p2 }
  0x3c   : > { %p837_p13 = pneg %p836_p6 }
  0x3d   : > { %p843_p10 = por %p842_p7, %p841_p4 }
  0x3f   : > { %p844_p12 = pnand %p843_p10, %p837_p13 }
  0x41   : > { %847 = shalt.err (!%p844_p12)
}
  0x42   : > { %s848_s18 = scalar_lea.vmem %s1139_s4, 64  ;;  %s986_s22 = smov [#allocation5]  }
  0x43   : > { %p849_p9 = scmp.ne.s32.totalorder %s1139_s4, %s848_s18  ;;  %s853_s23 = sshll.u32 %s986_s22, 4  ;;  %s854_s23 = int_to_ptr.vmem [resolvable:$false] %s853_s23 }
  0x44   : > { %s855_s30 = scalar_lea.vmem %s854_s23, 128  ;;  %p856_p8 = scmp.lt.s32.totalorder %s1139_s4, %s854_s23 }
  0x45   : > { %p851_p1 = pnand %p849_p9, %p805_p3  ;;  %p857_p2 = scmp.lt.s32.totalorder %s855_s30, %s848_s18 }
  0x47   : > { %p852_p6 = pneg %p851_p1  ;;  %p858_p5 = por %p857_p2, %p856_p8 }
  0x49   : > { %p859_p4 = pnand %p858_p5, %p852_p6 }
  0x4b   : > { %862 = shalt.err (!%p859_p4)
}
  0x4c   : > { %s987_s8 = smov 32   ;;  %s988_s10 = smov 2  }
  0x4d   : > { %718 = dma.hbm_to_vmem [thread:$0]  (!%p1092_p0), %s1137_s29, 64, %s1139_s4, %s204_s6, %s987_s8, %s987_s8, %s988_s10  }
  0x4e   : > { %229 = sbr.rel (%p1130_p11) target bundleno = 176 (0xb0), region = 28  ;;  %s1170_s5 = sand.u32 (!%p1130_p11), 1, %s965_s13  }
  0x4f   : > { %s1173_s7 = sshll.u32 (!%p1130_p11), %s1170_s5, 6  ;;  %s232_s11 = scalar_lea.sflag (!%p1130_p11), [#allocation3], %s1170_s5 }
  0x50   : > { %s235_s19 = scalar_lea.vmem (!%p1130_p11), [#allocation2], %s1173_s7  ;;  %p1318_p8 = scmp.ne.s32.totalorder (!%p1130_p11), %s1312_s24, 0 }
  0x55   : > { %944 = dma.done.wait (%p1318_p8), %s232_s11, 1024  }
  0x56   : > { %946 = vsyncadd (%p1318_p8), %s232_s11, 4294966272  ;;  %s675_s28 = sshll.u32 %s1170_s5, 2  ;;  %s241_s9 = scalar_lea.sflag [#allocation6], %s1170_s5 }
  0x57   : > { %s1183_s21 = scalar_lea.vmem [#allocation5], %s675_s28 }
  0x58   : > { %948 = dma.done.wait (%p1318_p8), %s241_s9, 64  }
  0x59   : > { %950 = vsyncadd (%p1318_p8), %s241_s9, 4294967232  ;;  %v301_v0 = vld [vmem:[%s235_s19] sm:$0xff]  ;;  %v303_v1 = vld [vmem:[%s235_s19 + $0x10] sm:$0xff]  ;;  %v989_v47 = vmov 0.0   ;;  %s698_s24 = sshll.u32 %s973_s15, 10  ;;  %s269_s29 = scalar_lea.vmem [#allocation7], %s1173_s7 }
  0x5a   : > { %v305_v2 = vld [vmem:[%s235_s19 + $0x20] sm:$0xff]  ;;  %v307_v3 = vld [vmem:[%s235_s19 + $0x30] sm:$0xff]  ;;  %v302_v5 = vld [vmem:[%s235_s19 + $0x8] sm:$0xff]  ;;  %s497_s4 = sshll.u32 %s269_s29, 4  ;;  %s1200_s22 = scalar_lea.hbm %s1307_s2, %s698_s24  ;;  %s1202_s4 = int_to_ptr.vmem [resolvable:$true] %s497_s4 }
  0x5b   : > { %v337_v4 = vmax.f32 %v301_v0, %v305_v2  ;;  %v338_v6 = vmax.f32 %v303_v1, %v307_v3  ;;  %v304_v7 = vld [vmem:[%s235_s19 + $0x18] sm:$0xff]  ;;  %v306_v8 = vld [vmem:[%s235_s19 + $0x28] sm:$0xff]  ;;  %v701_v42 = vld [vmem:[%s1183_s21] sm:$0xf]   ;;  %s1205_s23 = scalar_lea.vmem [#allocation8], %s1173_s7  ;;  %s478_s8 = scalar_lea.sflag [#allocation4], %s1170_s5 }
  0x5c   : > { %v308_v9 = vld [vmem:[%s235_s19 + $0x38] sm:$0xff]  ;;  %v340_v10 = vmax.f32 %v302_v5, %v306_v8  ;;  %v702_v45 = vunpack.c.0.s8 %v701_v42  ;;  %v703_v46 = vunpack.c.1.s8 %v701_v42  ;;  %s514_s30 = sshll.u32 %s1205_s23, 4  ;;  %s863_s10 = scalar_lea.vmem %s1202_s4, 1024  ;;  %s1251_s30 = int_to_ptr.vmem [resolvable:$true] %s514_s30 }
  0x5d   : > { %v341_v11 = vmax.f32 %v304_v7, %v308_v9  ;;  %v339_v12 = vmax.f32 %v337_v4, %v338_v6  ;;  %p864_p0 = scmp.ne.s32.totalorder %s1202_s4, %s863_s10  ;;  %p1319_p3 = scmp.ne.s32.totalorder %s1313_s25, 0 }
  0x5e   : > { %vm313_vm0 = vcmp.eq.s32.totalorder %v702_v45, 0  ;;  %vm314_vm1 = vcmp.eq.s32.totalorder %v703_v46, 0  ;;  %vm315_vm2 = vcmp.eq.s32.totalorder %v702_v45, 1  ;;  %vm317_vm3 = vcmp.eq.s32.totalorder %v702_v45, 2  ;;  %s990_s7 = smov [#allocation7]  }
  0x5f   : > { %v342_v13 = vmax.f32 %v340_v10, %v341_v11  ;;  %v343_v14 = vsub.f32 %v301_v0, %v339_v12  ;;  %v345_v15 = vsub.f32 %v303_v1, %v339_v12  ;;  %v347_v16 = vsub.f32 %v305_v2, %v339_v12  ;;  %p865_p11 = pnand %p864_p0, %p1319_p3  ;;  %s867_s11 = sshll.u32 %s990_s7, 4  ;;  %s868_s11 = int_to_ptr.vmem [resolvable:$false] %s867_s11 }
  0x60   : > { %v349_v17 = vsub.f32 %v307_v3, %v339_v12  ;;  %vm319_vm4 = vcmp.eq.s32.totalorder %v702_v45, 3  ;;  %vm399_vm5 = vcmp.ge.s32.totalorder %v702_v45, 0  ;;  %v678_v48 = vsel %vm313_vm0, 1.0, %v989_v47  ;;  %s869_s19 = scalar_lea.vmem %s868_s11, 2048  ;;  %p870_p7 = scmp.lt.s32.totalorder %s1202_s4, %s868_s11 }
  0x61   : > { %v344_v18 = vsub.f32 %v302_v5, %v342_v13  ;;  %v346_v19 = vsub.f32 %v304_v7, %v342_v13  ;;  %v351_v20 = vmul.f32 1.442695, %v343_v14  ;;  %v355_v21 = vmul.f32 1.442695, %v345_v15  ;;  %p866_p13 = pneg %p865_p11  ;;  %p871_p10 = scmp.lt.s32.totalorder %s869_s19, %s863_s10 }
  0x62   : > { %v359_v22 = vmul.f32 1.442695, %v347_v16  ;;  %v348_v23 = vsub.f32 %v306_v8, %v342_v13  ;;  %v363_v24 = vmul.f32 1.442695, %v349_v17  ;;  %v350_v25 = vsub.f32 %v308_v9, %v342_v13 }
  0x63   : > { %783 = vpow2.f32 %v351_v20  ;;  %v353_v26 = vmul.f32 1.442695, %v344_v18  ;;  %v357_v27 = vmul.f32 1.442695, %v346_v19  ;;  %v679_v49 = vsel %vm314_vm1, 1.0, %v989_v47  ;;  %p872_p12 = por %p871_p10, %p870_p7 }
  0x64   : > { %785 = vpow2.f32 %v355_v21  ;;  %v361_v28 = vmul.f32 1.442695, %v348_v23  ;;  %v365_v29 = vmul.f32 1.442695, %v350_v25  ;;  %vm316_vm6 = vcmp.eq.s32.totalorder %v703_v46, 1 }
  0x65   : > { %787 = vpow2.f32 %v359_v22  ;;  %vm318_vm7 = vcmp.eq.s32.totalorder %v703_v46, 2  ;;  %vm320_vm8 = vcmp.eq.s32.totalorder %v703_v46, 3  ;;  %vm400_vm9 = vcmp.ge.s32.totalorder %v703_v46, 0  ;;  %p873_p9 = pnand %p872_p12, %p866_p13 }
  0x66   : > { %789 = vpow2.f32 %v363_v24  ;;  %v680_v51 = vsel %vm315_vm2, 1.0, %v989_v47  ;;  %v682_v52 = vsel %vm317_vm3, 1.0, %v989_v47  ;;  %v684_v53 = vsel %vm319_vm4, 1.0, %v989_v47 }
  0x67   : > { %791 = vpow2.f32 %v353_v26  ;;  %v686_v54 = vsel %vm399_vm5, 1.0, %v989_v47  ;;  %v681_v59 = vsel %vm316_vm6, 1.0, %v989_v47  ;;  %v683_v60 = vsel %vm318_vm7, 1.0, %v989_v47 }
  0x68   : > { %793 = vpow2.f32 %v357_v27  ;;  %v1190_v61 = vsel %vm320_vm8, 1.0, %v989_v47  ;;  %v687_v62 = vsel %vm400_vm9, 1.0, %v989_v47 }
  0x69   : > { %795 = vpow2.f32 %v361_v28 }
  0x6a   : > { %797 = vpow2.f32 %v365_v29 }
  0x6d   : > { %v784_v30 = vpop.eup %783 }
  0x6e   : > { %v786_v31 = vpop.eup %785 }
  0x6f   : > { %v788_v32 = vpop.eup %787  ;;  %v367_v33 = vadd.f32 %v786_v31, %v784_v30 }
  0x70   : > { %v790_v34 = vpop.eup %789 }
  0x71   : > { %v792_v35 = vpop.eup %791  ;;  %v368_v36 = vadd.f32 %v788_v32, %v367_v33 }
  0x72   : > { %v794_v37 = vpop.eup %793 }
  0x73   : > { %v796_v38 = vpop.eup %795  ;;  %v369_v39 = vadd.f32 %v790_v34, %v368_v36  ;;  %v370_v40 = vadd.f32 %v794_v37, %v792_v35 }
  0x74   : > { %v798_v41 = vpop.eup %797 }
  0x75   : > { %799 = vrcp.f32 %v369_v39  ;;  %v371_v43 = vadd.f32 %v796_v38, %v370_v40 }
  0x77   : > { %v372_v44 = vadd.f32 %v798_v41, %v371_v43 }
  0x79   : > { %801 = vrcp.f32 %v372_v44 }
  0x7f   : > { %v800_v50 = vpop.eup %799 }
  0x80   : > { %v375_v55 = vmul.f32 %v800_v50, %v784_v30  ;;  %v377_v56 = vmul.f32 %v800_v50, %v786_v31  ;;  %v379_v57 = vmul.f32 %v800_v50, %v788_v32  ;;  %v381_v58 = vmul.f32 %v800_v50, %v790_v34 }
  0x82   : > { %v383_v63 = vmul.f32 %v678_v48, %v375_v55  ;;  %v385_v0 = vmul.f32 %v680_v51, %v377_v56  ;;  %v387_v1 = vmul.f32 %v682_v52, %v379_v57  ;;  %v389_v2 = vmul.f32 %v684_v53, %v381_v58 }
  0x83   : > { %v802_v3 = vpop.eup %801  ;;  %v405_v4 = vmul.f32 %v686_v54, %v375_v55  ;;  %v407_v5 = vmul.f32 %v686_v54, %v377_v56  ;;  %v409_v6 = vmul.f32 %v686_v54, %v379_v57  ;;  %v411_v7 = vmul.f32 %v686_v54, %v381_v58 }
  0x84   : > { %v376_v8 = vmul.f32 %v802_v3, %v792_v35  ;;  %v378_v9 = vmul.f32 %v802_v3, %v794_v37  ;;  %v380_v10 = vmul.f32 %v802_v3, %v796_v38  ;;  %v382_v11 = vmul.f32 %v802_v3, %v798_v41  ;;  %445 = vst [vmem:[%s269_s29] sm:$0xff] %v383_v63 }
  0x85   : > { %447 = vst [vmem:[%s269_s29 + $0x10] sm:$0xff] %v385_v0  ;;  %v421_v14 = vadd.f32 %v678_v48, %v405_v4  ;;  %449 = vst [vmem:[%s269_s29 + $0x20] sm:$0xff] %v387_v1  ;;  %v423_v18 = vadd.f32 %v680_v51, %v407_v5  ;;  %v425_v22 = vadd.f32 %v682_v52, %v409_v6 }
  0x86   : > { %v384_v12 = vmul.f32 %v679_v49, %v376_v8  ;;  %v386_v13 = vmul.f32 %v681_v59, %v378_v9  ;;  %v406_v15 = vmul.f32 %v687_v62, %v376_v8  ;;  %v388_v16 = vmul.f32 %v683_v60, %v380_v10  ;;  %451 = vst [vmem:[%s269_s29 + $0x30] sm:$0xff] %v389_v2 }
  0x87   : > { %v390_v17 = vmul.f32 %v1190_v61, %v382_v11  ;;  %v408_v19 = vmul.f32 %v687_v62, %v378_v9  ;;  %469 = vst [vmem:[%s1205_s23] sm:$0xff] %v421_v14  ;;  %v410_v23 = vmul.f32 %v687_v62, %v380_v10  ;;  %v427_v24 = vadd.f32 %v684_v53, %v411_v7 }
  0x88   : > { %v422_v20 = vadd.f32 %v679_v49, %v406_v15  ;;  %446 = vst [vmem:[%s269_s29 + $0x8] sm:$0xff] %v384_v12  ;;  %448 = vst [vmem:[%s269_s29 + $0x18] sm:$0xff] %v386_v13  ;;  %v412_v25 = vmul.f32 %v687_v62, %v382_v11 }
  0x89   : > { %v424_v21 = vadd.f32 %v681_v59, %v408_v19  ;;  %450 = vst [vmem:[%s269_s29 + $0x28] sm:$0xff] %v388_v16  ;;  %452 = vst [vmem:[%s269_s29 + $0x38] sm:$0xff] %v390_v17  ;;  %v426_v26 = vadd.f32 %v683_v60, %v410_v23 }
  0x8a   : > { %471 = vst [vmem:[%s1205_s23 + $0x10] sm:$0xff] %v423_v18  ;;  %470 = vst [vmem:[%s1205_s23 + $0x8] sm:$0xff] %v422_v20 }
  0x8b   : > { %876 = shalt.err (!%p873_p9)
}
  0x8c   : > { %s877_s28 = scalar_lea.hbm %s1200_s22, 1024  ;;  %s881_s29 = scalar_lea.hbm %s1307_s2, 2048 }
  0x8d   : > { %p878_p1 = scmp.ne.s32.totalorder %s1200_s22, %s877_s28  ;;  %p882_p5 = scmp.lt.u32.totalorder %s1200_s22, %s1307_s2 }
  0x8e   : > { %p883_p4 = scmp.lt.u32.totalorder %s881_s29, %s877_s28  ;;  %p885_p0 = scmp.lt.u32.totalorder %s877_s28, %s1200_s22 }
  0x8f   : > { %p879_p6 = pnand %p878_p1, %p1319_p3 }
  0x90   : > { %p884_p8 = por %p883_p4, %p882_p5 }
  0x91   : > { %p880_p2 = pneg %p879_p6 }
  0x92   : > { %p886_p11 = por %p885_p0, %p884_p8 }
  0x94   : > { %p887_p13 = pnand %p886_p11, %p880_p2 }
  0x96   : > { %890 = shalt.err (!%p887_p13)
}
  0x97   : > { %s991_s10 = smov 128   ;;  %s992_s7 = smov 8   ;;  %472 = vst [vmem:[%s1205_s23 + $0x18] sm:$0xff] %v424_v21  ;;  %v428_v27 = vadd.f32 %v1190_v61, %v412_v25  ;;  %473 = vst [vmem:[%s1205_s23 + $0x20] sm:$0xff] %v425_v22 }
  0x98   : > { %708 = dma.vmem_to_hbm [thread:$0]  (%p1319_p3), %s1202_s4, 1024, %s1200_s22, %s478_s8, %s991_s10, %s991_s10, %s992_s7  }
  0x99   : > { %475 = vst [vmem:[%s1205_s23 + $0x30] sm:$0xff] %v427_v24  ;;  %s1247_s28 = scalar_lea.hbm %s1308_s3, %s698_s24  ;;  %474 = vst [vmem:[%s1205_s23 + $0x28] sm:$0xff] %v426_v26  ;;  %s483_s4 = scalar_lea.sflag [#allocation9], %s1170_s5 }
  0x9a   : > { %476 = vst [vmem:[%s1205_s23 + $0x38] sm:$0xff] %v428_v27  ;;  %s891_s22 = scalar_lea.vmem %s1251_s30, 1024  ;;  %s993_s15 = smov [#allocation8]  }
  0x9b   : > { %p892_p7 = scmp.ne.s32.totalorder %s1251_s30, %s891_s22  ;;  %s895_s8 = sshll.u32 %s993_s15, 4  ;;  %s896_s8 = int_to_ptr.vmem [resolvable:$false] %s895_s8 }
  0x9c   : > { %s897_s9 = scalar_lea.vmem %s896_s8, 2048  ;;  %p898_p9 = scmp.lt.s32.totalorder %s1251_s30, %s896_s8 }
  0x9d   : > { %p893_p10 = pnand %p892_p7, %p1319_p3  ;;  %p899_p1 = scmp.lt.s32.totalorder %s897_s9, %s891_s22 }
  0x9f   : > { %p894_p12 = pneg %p893_p10  ;;  %p900_p6 = por %p899_p1, %p898_p9 }
  0xa1   : > { %p901_p2 = pnand %p900_p6, %p894_p12 }
  0xa3   : > { %904 = shalt.err (!%p901_p2)
}
  0xa4   : > { %s905_s24 = scalar_lea.hbm %s1247_s28, 1024  ;;  %s909_s29 = scalar_lea.hbm %s1308_s3, 2048 }
  0xa5   : > { %p906_p5 = scmp.ne.s32.totalorder %s1247_s28, %s905_s24  ;;  %p910_p0 = scmp.lt.u32.totalorder %s1247_s28, %s1308_s3 }
  0xa6   : > { %p911_p11 = scmp.lt.u32.totalorder %s909_s29, %s905_s24  ;;  %p913_p7 = scmp.lt.u32.totalorder %s905_s24, %s1247_s28 }
  0xa7   : > { %p907_p4 = pnand %p906_p5, %p1319_p3 }
  0xa8   : > { %p912_p13 = por %p911_p11, %p910_p0 }
  0xa9   : > { %p908_p8 = pneg %p907_p4 }
  0xaa   : > { %p914_p10 = por %p913_p7, %p912_p13 }
  0xac   : > { %p915_p12 = pnand %p914_p10, %p908_p8 }
  0xae   : > { %918 = shalt.err (!%p915_p12)
}
  0xaf   : > { %709 = dma.vmem_to_hbm [thread:$0]  (%p1319_p3), %s1251_s30, 1024, %s1247_s28, %s483_s4, %s991_s10, %s991_s10, %s992_s7  }
  0xb0 PF: > { %s529_s11 = sand.u32 1, %s961_s12   ;;  %p1320_p9 = scmp.ne.s32.totalorder %s1314_s27, 0 }
  0xb1   : > { %p1321_p1 = scmp.ge.s32.totalorder %s981_s17, 2  ;;  %s530_s19 = scalar_lea.sflag [#allocation4], %s529_s11 }
  0xb3   : > { %p720_p6 = pnand %p1321_p1, %p1320_p9 }
  0xb5   : > { %952 = dma.done.wait (!%p720_p6), %s530_s19, 1024  }
  0xb6   : > { %954 = vsyncadd (!%p720_p6), %s530_s19, 4294966272  ;;  %s539_s25 = scalar_lea.sflag [#allocation9], %s529_s11 }
  0xb7   : > { %956 = dma.done.wait (!%p720_p6), %s539_s25, 1024  }
  0xb8   : > { %958 = vsyncadd (!%p720_p6), %s539_s25, 4294966272  ;;  %s26_s17 = sadd.s32 1, %s981_s17   ;;  %s1322_s12 = smov %s965_s13 }
  0xb9   : > { %p23_p2 = scmp.ge.s32.totalorder %s26_s17, 4   ;;  %s1323_s13 = smov %s969_s14 }
  0xba   : > { %s1324_s14 = smov %s1070_s26  ;;  %s1325_s15 = smov %s977_s16 }
  0xbb   : > { %s1326_s16 = smov %s1328_s20  ;;  %25 = sbr.rel (!%p23_p2) target bundleno = 10 (0xa), region = 107 }
  0xc2   :  { %544 = vsyncpa [#allocation3], 1 }
  0xc3   :  { %546 = vsyncpa [#allocation3 + $0x1], 1 }
  0xc4   :  { %547 = vsyncpa [#allocation6], 1 }
  0xc5   :  { %549 = vsyncpa [#allocation6 + $0x1], 1 }
  0xc6   :  { %550 = vsyncpa [#allocation4], 1 }
  0xc7   :  { %552 = vsyncpa [#allocation4 + $0x1], 1 }
  0xc8   :  { %553 = vsyncpa [#allocation9], 1 }
  0xc9   :  { %555 = vsyncpa [#allocation9 + $0x1], 1 }

</bundles_post_ra>
